<compile_context>
chip_gen: v7x
topology: tpu7x:2x2x1
jax: 0.10.0
libtpu: 0.0.40
codegen_flags: <defaults>
</compile_context>

<pallas_src>
import functools

import jax
import jax.numpy as jnp
from jax import lax
from jax.experimental import pallas as pl
from jax.experimental.pallas import tpu as pltpu


# ---------------------------------------------------------------------------
# Kernel: one bidirectional LSTM step per grid iteration.
#   fwd half processes time s, bwd half processes time T-1-s (length-masked
#   state freeze reproduces pack/pad semantics given zero initial state).
# ---------------------------------------------------------------------------
def _bilstm_step_kernel(lens_ref, gxf_ref, gxb_ref, whh_ref,
                        out_f_ref, out_b_ref, hn_ref, cn_ref, *, hidden_dim):
    H = hidden_dim
    s = pl.program_id(0)
    T = pl.num_programs(0)

    # State lives in the hn/cn output refs (constant block index -> resident
    # across the whole grid; written back to HBM once at the end).
    @pl.when(s == 0)
    def _init():
        hn_ref[...] = jnp.zeros_like(hn_ref)
        cn_ref[...] = jnp.zeros_like(cn_ref)

    h = hn_ref[...]                       # (B, 2H) f32, layout [h_fwd | h_bwd]
    c = cn_ref[...]                       # (B, 2H) f32

    # Single 8H-wide MXU push for both directions (block-diag whh).  Only this
    # matmul sits on the serial critical path; the x-projection was hoisted
    # into one big XLA matmul in the wrapper.
    gh = jnp.dot(h.astype(jnp.bfloat16), whh_ref[...],
                 preferred_element_type=jnp.float32)          # (B, 8H)

    gates_f = gxf_ref[...] + gh[:, :4 * H]                    # (B, 4H) time s
    gates_b = gxb_ref[...] + gh[:, 4 * H:]                    # (B, 4H) time T-1-s

    def lstm_gates(g, c_half):
        # PyTorch gate order: i, f, g, o.  At production H>=128 these slices
        # are lane-aligned; at the demo H=32 they stay inside one vreg.
        i_g = jax.nn.sigmoid(g[:, 0 * H:1 * H])
        f_g = jax.nn.sigmoid(g[:, 1 * H:2 * H])
        g_g = jnp.tanh(g[:, 2 * H:3 * H])
        o_g = jax.nn.sigmoid(g[:, 3 * H:4 * H])
        c_new = f_g * c_half + i_g * g_g
        h_new = o_g * jnp.tanh(c_new)
        return h_new, c_new

    hf_new, cf_new = lstm_gates(gates_f, c[:, :H])
    hb_new, cb_new = lstm_gates(gates_b, c[:, H:])
    h_new = jnp.concatenate([hf_new, hb_new], axis=-1)        # (B, 2H)
    c_new = jnp.concatenate([cf_new, cb_new], axis=-1)        # (B, 2H)

    # Per-step length mask built in-kernel (no (T,B,2H) mask tensor in HBM):
    # fwd columns compare against t=s, bwd columns against t=T-1-s.
    col = lax.broadcasted_iota(jnp.int32, (1, 2 * H), 1)
    t_eff = jnp.where(col < H, s, T - 1 - s)                  # (1, 2H) int32
    m = lens_ref[...] > t_eff                                 # (B, 2H) bool

    hn_ref[...] = jnp.where(m, h_new, h)                      # freeze past length
    cn_ref[...] = jnp.where(m, c_new, c)
    y = jnp.where(m, h_new, 0.0)                              # padded steps -> 0
    out_f_ref[...] = y[:, :H]                                 # time slot s
    out_b_ref[...] = y[:, H:]                                 # time slot T-1-s (via index_map)


# ---------------------------------------------------------------------------
# Wrapper (mirrors Encoder.forward: returns (outputs, (hn, cn)))
# ---------------------------------------------------------------------------
def encoder_forward(inputs, inputs_len, params):
    embed = params["embed"]                                   # (V, D)
    x = jnp.take(embed, inputs, axis=0)                       # (B, T, D) gather (XLA glue)
    B, T, D = x.shape
    H = params["whh_f"].shape[0]                              # whh_f is (H, 4H) pre-transposed
    cdt = jnp.bfloat16                                        # MXU-native operand dtype

    # Hoisted dense input projection for BOTH directions on un-duplicated x:
    # one (T,B,D)@(D,8H) bf16 matmul with f32 accumulation, bias folded in.
    wih = jnp.concatenate([params["wih_f"], params["wih_b"]], axis=1).astype(cdt)   # (D, 8H)
    bias = jnp.concatenate([params["b_f"], params["b_b"]], axis=1).astype(jnp.float32)  # (1, 8H)
    x_tm = jnp.transpose(x, (1, 0, 2)).astype(cdt)            # (T, B, D) time-major
    gx = jnp.dot(x_tm, wih, preferred_element_type=jnp.float32) + bias              # (T, B, 8H) f32

    # Block-diag recurrent weight: rows [h_fwd | h_bwd] -> cols [fwd 4H | bwd 4H].
    zf = jnp.zeros_like(params["whh_f"])
    zb = jnp.zeros_like(params["whh_b"])
    whh = jnp.concatenate(
        [jnp.concatenate([params["whh_f"], zb], axis=1),
         jnp.concatenate([zf, params["whh_b"]], axis=1)], axis=0).astype(cdt)       # (2H, 8H)

    lens2d = inputs_len.astype(jnp.int32).reshape(B, 1)       # tiny, stays VMEM-resident

    kernel = functools.partial(_bilstm_step_kernel, hidden_dim=H)

    in_specs = [
        pl.BlockSpec((B, 1), lambda s: (0, 0)),                        # lens (resident)
        pl.BlockSpec((None, B, 4 * H), lambda s: (s, 0, 0)),           # fwd gate cols, time s
        pl.BlockSpec((None, B, 4 * H), lambda s: (T - 1 - s, 0, 1)),   # bwd gate cols, time T-1-s
        pl.BlockSpec((2 * H, 8 * H), lambda s: (0, 0)),                # whh (resident)
    ]
    out_specs = (
        pl.BlockSpec((None, B, H), lambda s: (s, 0, 0)),               # fwd outputs (time-major)
        pl.BlockSpec((None, B, H), lambda s: (T - 1 - s, 0, 0)),       # bwd outputs -> true slot
        pl.BlockSpec((B, 2 * H), lambda s: (0, 0)),                    # hn (carries state)
        pl.BlockSpec((B, 2 * H), lambda s: (0, 0)),                    # cn (carries state)
    )
    out_shape = (
        jax.ShapeDtypeStruct((T, B, H), jnp.float32),
        jax.ShapeDtypeStruct((T, B, H), jnp.float32),
        jax.ShapeDtypeStruct((B, 2 * H), jnp.float32),
        jax.ShapeDtypeStruct((B, 2 * H), jnp.float32),
    )

    out_f, out_b, hn, cn = pl.pallas_call(
        kernel,
        grid=(T,),
        in_specs=in_specs,
        out_specs=out_specs,
        out_shape=out_shape,
        compiler_params=pltpu.CompilerParams(
            dimension_semantics=("arbitrary",),        # serial recurrence axis
            vmem_limit_bytes=32 * 1024 * 1024),        # explicit cap (safe on v5e/v6e/v7x)
    )(lens2d, gx, gx, whh)

    # Assemble batch-first [fwd | bwd] output (single fused XLA pass).
    outputs = jnp.concatenate(
        [jnp.transpose(out_f, (1, 0, 2)), jnp.transpose(out_b, (1, 0, 2))], axis=-1)
    return outputs, (hn, cn)


# ---------------------------------------------------------------------------
# Synthetic parameters (same shapes as the torch module)
# ---------------------------------------------------------------------------
def make_params(key, vocab_size, input_dim, hidden_dim):
    D, H, V = input_dim, hidden_dim, vocab_size
    ks = jax.random.split(key, 9)
    s = 0.1
    # Torch stores W_ih: (4H, D), W_hh: (4H, H); we pre-transpose for x @ W.
    w_ih_f = jax.random.normal(ks[0], (4 * H, D), jnp.float32) * s
    w_hh_f = jax.random.normal(ks[1], (4 * H, H), jnp.float32) * s
    b_ih_f = jax.random.normal(ks[2], (4 * H,), jnp.float32) * s
    b_hh_f = jax.random.normal(ks[3], (4 * H,), jnp.float32) * s
    w_ih_b = jax.random.normal(ks[4], (4 * H, D), jnp.float32) * s
    w_hh_b = jax.random.normal(ks[5], (4 * H, H), jnp.float32) * s
    b_ih_b = jax.random.normal(ks[6], (4 * H,), jnp.float32) * s
    b_hh_b = jax.random.normal(ks[7], (4 * H,), jnp.float32) * s
    embed = jax.random.normal(ks[8], (V, D), jnp.float32)     # synthetic "pretrained" embedding
    return {
        "embed": embed,
        "wih_f": w_ih_f.T, "whh_f": w_hh_f.T, "b_f": (b_ih_f + b_hh_f).reshape(1, 4 * H),
        "wih_b": w_ih_b.T, "whh_b": w_hh_b.T, "b_b": (b_ih_b + b_hh_b).reshape(1, 4 * H),
    }


# ---------------------------------------------------------------------------
# Pure-JAX reference (per-direction masked LSTM, PyTorch gate order/semantics).
# Matmul operands are rounded to bf16 (as on the MXU) but all math is f32, so
# it tracks the kernel closely while keeping packed-sequence semantics.
# ---------------------------------------------------------------------------
def reference_forward(inputs, inputs_len, params):
    rnd = lambda a: a.astype(jnp.bfloat16).astype(jnp.float32)
    embed = params["embed"]
    x = rnd(jnp.take(embed, inputs, axis=0))
    B, T, D = x.shape
    H = params["whh_f"].shape[0]
    lens = inputs_len.astype(jnp.int32)

    def run_dir(wih, whh, b, reverse):
        wih, whh = rnd(wih), rnd(whh)
        h = jnp.zeros((B, H), jnp.float32)
        c = jnp.zeros((B, H), jnp.float32)
        outs = [None] * T
        ts = range(T - 1, -1, -1) if reverse else range(T)
        for t in ts:
            gates = x[:, t, :] @ wih + rnd(h) @ whh + b
            i_g = jax.nn.sigmoid(gates[:, 0:H])
            f_g = jax.nn.sigmoid(gates[:, H:2 * H])
            g_g = jnp.tanh(gates[:, 2 * H:3 * H])
            o_g = jax.nn.sigmoid(gates[:, 3 * H:4 * H])
            c_new = f_g * c + i_g * g_g
            h_new = o_g * jnp.tanh(c_new)
            m = (lens > t).astype(jnp.float32)[:, None]
            h = m * h_new + (1.0 - m) * h
            c = m * c_new + (1.0 - m) * c
            outs[t] = m * h_new
        return jnp.stack(outs, axis=1), h, c

    of, hf, cf = run_dir(params["wih_f"], params["whh_f"], params["b_f"], False)
    ob, hb, cb = run_dir(params["wih_b"], params["whh_b"], params["b_b"], True)
    return (jnp.concatenate([of, ob], axis=-1),
            (jnp.concatenate([hf, hb], axis=1), jnp.concatenate([cf, cb], axis=1)))


if __name__ == "__main__":
    # Small shapes consistent with the module: B=2, T=8, input_dim=16, hidden=32.
    B, T, D, H, V = 2, 8, 16, 32, 20

    key = jax.random.PRNGKey(0)
    k_par, k_tok = jax.random.split(key)
    params = make_params(k_par, vocab_size=V, input_dim=D, hidden_dim=H)

    inputs = jax.random.randint(k_tok, (B, T), 0, V, dtype=jnp.int32)
    inputs_len = jnp.array([T, 5], dtype=jnp.int32)   # variable lengths (padded batch)

    outputs, (hn, cn) = encoder_forward(inputs, inputs_len, params)
    outputs = jax.block_until_ready(outputs)
    hn = jax.block_until_ready(hn)
    cn = jax.block_until_ready(cn)

    r_out, (r_hn, r_cn) = reference_forward(inputs, inputs_len, params)
    assert outputs.shape == (B, T, 2 * H)
    assert hn.shape == (B, 2 * H) and cn.shape == (B, 2 * H)
    assert jnp.allclose(outputs, r_out, atol=2e-3, rtol=2e-3)
    assert jnp.allclose(hn, r_hn, atol=2e-3, rtol=2e-3)
    assert jnp.allclose(cn, r_cn, atol=2e-3, rtol=2e-3)

    print("KERNEL_OK")
</pallas_src>

<mosaic_0001>
module attributes {stable_mosaic.version = 11 : i64} {
  func.func @_bilstm_step_kernel(%arg0: i32, %arg1: memref<2x1xi32, #tpu.memory_space<vmem>>, %arg2: memref<1x2x128xf32, #tpu.memory_space<vmem>>, %arg3: memref<1x2x128xf32, #tpu.memory_space<vmem>>, %arg4: memref<64x256xbf16, #tpu.memory_space<vmem>>, %arg5: memref<1x2x32xf32, #tpu.memory_space<vmem>>, %arg6: memref<1x2x32xf32, #tpu.memory_space<vmem>>, %arg7: memref<2x64xf32, #tpu.memory_space<vmem>>, %arg8: memref<2x64xf32, #tpu.memory_space<vmem>>) attributes {dimension_semantics = [#tpu.dimension_semantics<arbitrary>], iteration_bounds = array<i64: 8>, scalar_prefetch = 0 : i64, scratch_operands = 0 : i64, tpu.core_type = #tpu.core_type<tc>, window_params = [{pipeline_mode = #tpu.pipeline_mode<synchronous>, transform_indices = @transform_0, window_bounds = array<i64: 2, 1>}, {transform_indices = @transform_1, window_bounds = array<i64: 1, 2, 128>}, {transform_indices = @transform_2, window_bounds = array<i64: 1, 2, 128>}, {pipeline_mode = #tpu.pipeline_mode<synchronous>, transform_indices = @transform_3, window_bounds = array<i64: 64, 256>}, {transform_indices = @transform_4, window_bounds = array<i64: 1, 2, 32>}, {transform_indices = @transform_5, window_bounds = array<i64: 1, 2, 32>}, {pipeline_mode = #tpu.pipeline_mode<synchronous>, transform_indices = @transform_6, window_bounds = array<i64: 2, 64>}, {pipeline_mode = #tpu.pipeline_mode<synchronous>, transform_indices = @transform_7, window_bounds = array<i64: 2, 64>}]} {
    %c0_i32 = arith.constant 0 : i32
    %0 = arith.cmpi eq, %arg0, %c0_i32 : i32
    %1 = arith.extui %0 : i1 to i32
    %c0_i32_0 = arith.constant 0 : i32
    %2 = arith.cmpi ne, %1, %c0_i32_0 : i32
    scf.if %2 {
      %cst_31 = arith.constant 0.000000e+00 : f32
      %95 = vector.broadcast %cst_31 : f32 to vector<2x64xf32>
      %c0_32 = arith.constant 0 : index
      %c0_33 = arith.constant 0 : index
      %96 = vector.load %arg7[%c0_32, %c0_33] : memref<2x64xf32, #tpu.memory_space<vmem>>, vector<2x64xf32>
      tpu.vector_store %arg7[%c0_32, %c0_33], %95 {strides = array<i32>} : memref<2x64xf32, #tpu.memory_space<vmem>>, vector<2x64xf32>,
      %cst_34 = arith.constant 0.000000e+00 : f32
      %97 = vector.broadcast %cst_34 : f32 to vector<2x64xf32>
      %c0_35 = arith.constant 0 : index
      %c0_36 = arith.constant 0 : index
      %98 = vector.load %arg8[%c0_35, %c0_36] : memref<2x64xf32, #tpu.memory_space<vmem>>, vector<2x64xf32>
      tpu.vector_store %arg8[%c0_35, %c0_36], %97 {strides = array<i32>} : memref<2x64xf32, #tpu.memory_space<vmem>>, vector<2x64xf32>,
    } else {
    }
    %c0 = arith.constant 0 : index
    %c0_1 = arith.constant 0 : index
    %3 = vector.load %arg7[%c0, %c0_1] : memref<2x64xf32, #tpu.memory_space<vmem>>, vector<2x64xf32>
    %c0_2 = arith.constant 0 : index
    %c0_3 = arith.constant 0 : index
    %4 = vector.load %arg8[%c0_2, %c0_3] : memref<2x64xf32, #tpu.memory_space<vmem>>, vector<2x64xf32>
    %5 = arith.truncf %3 : vector<2x64xf32> to vector<2x64xbf16>
    %c0_4 = arith.constant 0 : index
    %c0_5 = arith.constant 0 : index
    %6 = vector.load %arg4[%c0_4, %c0_5] : memref<64x256xbf16, #tpu.memory_space<vmem>>, vector<64x256xbf16>
    %cst = arith.constant dense<0.000000e+00> : vector<2x256xf32>
    %7 = tpu.matmul %5, %6, %cst {dimension_numbers = #tpu.dot_dimension_numbers<[1], [0], [0], [1], [0, 0, 1, 1], [], []>} : vector<2x64xbf16>, vector<64x256xbf16>, vector<2x256xf32> -> vector<2x256xf32>
    %c0_6 = arith.constant 0 : index
    %c0_7 = arith.constant 0 : index
    %c0_8 = arith.constant 0 : index
    %8 = vector.load %arg2[%c0_6, %c0_7, %c0_8] : memref<1x2x128xf32, #tpu.memory_space<vmem>>, vector<1x2x128xf32>
    %9 = vector.shape_cast %8 : vector<1x2x128xf32> to vector<2x128xf32>
    %10 = vector.extract_strided_slice %7 {offsets = [0, 0], sizes = [2, 128], strides = [1, 1]} : vector<2x256xf32> to vector<2x128xf32>
    %11 = arith.addf %9, %10 : vector<2x128xf32>
    %c0_9 = arith.constant 0 : index
    %c0_10 = arith.constant 0 : index
    %c0_11 = arith.constant 0 : index
    %12 = vector.load %arg3[%c0_9, %c0_10, %c0_11] : memref<1x2x128xf32, #tpu.memory_space<vmem>>, vector<1x2x128xf32>
    %13 = vector.shape_cast %12 : vector<1x2x128xf32> to vector<2x128xf32>
    %14 = vector.extract_strided_slice %7 {offsets = [0, 128], sizes = [2, 128], strides = [1, 1]} : vector<2x256xf32> to vector<2x128xf32>
    %15 = arith.addf %13, %14 : vector<2x128xf32>
    %16 = vector.extract_strided_slice %4 {offsets = [0, 0], sizes = [2, 32], strides = [1, 1]} : vector<2x64xf32> to vector<2x32xf32>
    %17 = vector.extract_strided_slice %11 {offsets = [0, 0], sizes = [2, 32], strides = [1, 1]} : vector<2x128xf32> to vector<2x32xf32>
    %18 = arith.negf %17 : vector<2x32xf32>
    %19 = math.exp %18 : vector<2x32xf32>
    %cst_12 = arith.constant 1.000000e+00 : f32
    %20 = vector.broadcast %cst_12 : f32 to vector<2x32xf32>
    %21 = arith.addf %20, %19 : vector<2x32xf32>
    %22 = arith.divf %20, %21 : vector<2x32xf32>
    %23 = vector.extract_strided_slice %11 {offsets = [0, 32], sizes = [2, 32], strides = [1, 1]} : vector<2x128xf32> to vector<2x32xf32>
    %24 = arith.negf %23 : vector<2x32xf32>
    %25 = math.exp %24 : vector<2x32xf32>
    %cst_13 = arith.constant 1.000000e+00 : f32
    %26 = vector.broadcast %cst_13 : f32 to vector<2x32xf32>
    %27 = arith.addf %26, %25 : vector<2x32xf32>
    %28 = arith.divf %26, %27 : vector<2x32xf32>
    %29 = vector.extract_strided_slice %11 {offsets = [0, 64], sizes = [2, 32], strides = [1, 1]} : vector<2x128xf32> to vector<2x32xf32>
    %30 = math.tanh %29 : vector<2x32xf32>
    %31 = vector.extract_strided_slice %11 {offsets = [0, 96], sizes = [2, 32], strides = [1, 1]} : vector<2x128xf32> to vector<2x32xf32>
    %32 = arith.negf %31 : vector<2x32xf32>
    %33 = math.exp %32 : vector<2x32xf32>
    %cst_14 = arith.constant 1.000000e+00 : f32
    %34 = vector.broadcast %cst_14 : f32 to vector<2x32xf32>
    %35 = arith.addf %34, %33 : vector<2x32xf32>
    %36 = arith.divf %34, %35 : vector<2x32xf32>
    %37 = arith.mulf %28, %16 : vector<2x32xf32>
    %38 = arith.mulf %22, %30 : vector<2x32xf32>
    %39 = arith.addf %37, %38 : vector<2x32xf32>
    %40 = math.tanh %39 : vector<2x32xf32>
    %41 = arith.mulf %36, %40 : vector<2x32xf32>
    %42 = vector.extract_strided_slice %4 {offsets = [0, 32], sizes = [2, 32], strides = [1, 1]} : vector<2x64xf32> to vector<2x32xf32>
    %43 = vector.extract_strided_slice %15 {offsets = [0, 0], sizes = [2, 32], strides = [1, 1]} : vector<2x128xf32> to vector<2x32xf32>
    %44 = arith.negf %43 : vector<2x32xf32>
    %45 = math.exp %44 : vector<2x32xf32>
    %cst_15 = arith.constant 1.000000e+00 : f32
    %46 = vector.broadcast %cst_15 : f32 to vector<2x32xf32>
    %47 = arith.addf %46, %45 : vector<2x32xf32>
    %48 = arith.divf %46, %47 : vector<2x32xf32>
    %49 = vector.extract_strided_slice %15 {offsets = [0, 32], sizes = [2, 32], strides = [1, 1]} : vector<2x128xf32> to vector<2x32xf32>
    %50 = arith.negf %49 : vector<2x32xf32>
    %51 = math.exp %50 : vector<2x32xf32>
    %cst_16 = arith.constant 1.000000e+00 : f32
    %52 = vector.broadcast %cst_16 : f32 to vector<2x32xf32>
    %53 = arith.addf %52, %51 : vector<2x32xf32>
    %54 = arith.divf %52, %53 : vector<2x32xf32>
    %55 = vector.extract_strided_slice %15 {offsets = [0, 64], sizes = [2, 32], strides = [1, 1]} : vector<2x128xf32> to vector<2x32xf32>
    %56 = math.tanh %55 : vector<2x32xf32>
    %57 = vector.extract_strided_slice %15 {offsets = [0, 96], sizes = [2, 32], strides = [1, 1]} : vector<2x128xf32> to vector<2x32xf32>
    %58 = arith.negf %57 : vector<2x32xf32>
    %59 = math.exp %58 : vector<2x32xf32>
    %cst_17 = arith.constant 1.000000e+00 : f32
    %60 = vector.broadcast %cst_17 : f32 to vector<2x32xf32>
    %61 = arith.addf %60, %59 : vector<2x32xf32>
    %62 = arith.divf %60, %61 : vector<2x32xf32>
    %63 = arith.mulf %54, %42 : vector<2x32xf32>
    %64 = arith.mulf %48, %56 : vector<2x32xf32>
    %65 = arith.addf %63, %64 : vector<2x32xf32>
    %66 = math.tanh %65 : vector<2x32xf32>
    %67 = arith.mulf %62, %66 : vector<2x32xf32>
    %68 = tpu.concatenate %41, %67 in 1 : vector<2x32xf32>, vector<2x32xf32> -> vector<2x64xf32>
    %69 = tpu.concatenate %39, %65 in 1 : vector<2x32xf32>, vector<2x32xf32> -> vector<2x64xf32>
    %70 = tpu.iota {dimensions = array<i32: 1>} : vector<1x64xi32>
    %c32_i32 = arith.constant 32 : i32
    %71 = vector.broadcast %c32_i32 : i32 to vector<1x64xi32>
    %72 = arith.cmpi slt, %70, %71 : vector<1x64xi32>
    %c7_i32 = arith.constant 7 : i32
    %73 = arith.subi %c7_i32, %arg0 : i32
    %74 = vector.broadcast %arg0 : i32 to vector<1x64xi32>
    %75 = vector.broadcast %73 : i32 to vector<1x64xi32>
    %76 = arith.select %72, %74, %75 : vector<1x64xi1>, vector<1x64xi32>
    %c0_18 = arith.constant 0 : index
    %c0_19 = arith.constant 0 : index
    %77 = vector.load %arg1[%c0_18, %c0_19] : memref<2x1xi32, #tpu.memory_space<vmem>>, vector<2x1xi32>
    %78 = vector.broadcast %77 : vector<2x1xi32> to vector<2x64xi32>
    %79 = vector.broadcast %76 : vector<1x64xi32> to vector<2x64xi32>
    %80 = arith.cmpi sgt, %78, %79 : vector<2x64xi32>
    %81 = arith.select %80, %68, %3 : vector<2x64xi1>, vector<2x64xf32>
    %c0_20 = arith.constant 0 : index
    %c0_21 = arith.constant 0 : index
    %82 = vector.load %arg7[%c0_20, %c0_21] : memref<2x64xf32, #tpu.memory_space<vmem>>, vector<2x64xf32>
    tpu.vector_store %arg7[%c0_20, %c0_21], %81 {strides = array<i32>} : memref<2x64xf32, #tpu.memory_space<vmem>>, vector<2x64xf32>,
    %83 = arith.select %80, %69, %4 : vector<2x64xi1>, vector<2x64xf32>
    %c0_22 = arith.constant 0 : index
    %c0_23 = arith.constant 0 : index
    %84 = vector.load %arg8[%c0_22, %c0_23] : memref<2x64xf32, #tpu.memory_space<vmem>>, vector<2x64xf32>
    tpu.vector_store %arg8[%c0_22, %c0_23], %83 {strides = array<i32>} : memref<2x64xf32, #tpu.memory_space<vmem>>, vector<2x64xf32>,
    %cst_24 = arith.constant 0.000000e+00 : f32
    %85 = vector.broadcast %cst_24 : f32 to vector<2x64xf32>
    %86 = arith.select %80, %68, %85 : vector<2x64xi1>, vector<2x64xf32>
    %87 = vector.extract_strided_slice %86 {offsets = [0, 0], sizes = [2, 32], strides = [1, 1]} : vector<2x64xf32> to vector<2x32xf32>
    %c0_25 = arith.constant 0 : index
    %c0_26 = arith.constant 0 : index
    %c0_27 = arith.constant 0 : index
    %88 = vector.load %arg5[%c0_25, %c0_26, %c0_27] : memref<1x2x32xf32, #tpu.memory_space<vmem>>, vector<1x2x32xf32>
    %89 = vector.shape_cast %88 : vector<1x2x32xf32> to vector<2x32xf32>
    %90 = vector.shape_cast %87 : vector<2x32xf32> to vector<1x2x32xf32>
    tpu.vector_store %arg5[%c0_25, %c0_26, %c0_27], %90 {strides = array<i32>} : memref<1x2x32xf32, #tpu.memory_space<vmem>>, vector<1x2x32xf32>,
    %91 = vector.extract_strided_slice %86 {offsets = [0, 32], sizes = [2, 32], strides = [1, 1]} : vector<2x64xf32> to vector<2x32xf32>
    %c0_28 = arith.constant 0 : index
    %c0_29 = arith.constant 0 : index
    %c0_30 = arith.constant 0 : index
    %92 = vector.load %arg6[%c0_28, %c0_29, %c0_30] : memref<1x2x32xf32, #tpu.memory_space<vmem>>, vector<1x2x32xf32>
    %93 = vector.shape_cast %92 : vector<1x2x32xf32> to vector<2x32xf32>
    %94 = vector.shape_cast %91 : vector<2x32xf32> to vector<1x2x32xf32>
    tpu.vector_store %arg6[%c0_28, %c0_29, %c0_30], %94 {strides = array<i32>} : memref<1x2x32xf32, #tpu.memory_space<vmem>>, vector<1x2x32xf32>,
    return
  }
  func.func @transform_0(%arg0: i32) -> (i32, i32) {
    %c0_i32 = arith.constant 0 : i32
    %c0_i32_0 = arith.constant 0 : i32
    %c0_i32_1 = arith.constant 0 : i32
    return %c0_i32, %c0_i32_0 : i32, i32
  }
  func.func @transform_1(%arg0: i32) -> (i32, i32, i32) {
    %c0_i32 = arith.constant 0 : i32
    %c0_i32_0 = arith.constant 0 : i32
    %c0_i32_1 = arith.constant 0 : i32
    return %arg0, %c0_i32, %c0_i32_0 : i32, i32, i32
  }
  func.func @transform_2(%arg0: i32) -> (i32, i32, i32) {
    %c7_i32 = arith.constant 7 : i32
    %0 = arith.subi %c7_i32, %arg0 : i32
    %c0_i32 = arith.constant 0 : i32
    %c1_i32 = arith.constant 1 : i32
    %c0_i32_0 = arith.constant 0 : i32
    return %0, %c0_i32, %c1_i32 : i32, i32, i32
  }
  func.func @transform_3(%arg0: i32) -> (i32, i32) {
    %c0_i32 = arith.constant 0 : i32
    %c0_i32_0 = arith.constant 0 : i32
    %c0_i32_1 = arith.constant 0 : i32
    return %c0_i32, %c0_i32_0 : i32, i32
  }
  func.func @transform_4(%arg0: i32) -> (i32, i32, i32) {
    %c0_i32 = arith.constant 0 : i32
    %c0_i32_0 = arith.constant 0 : i32
    %c0_i32_1 = arith.constant 0 : i32
    return %arg0, %c0_i32, %c0_i32_0 : i32, i32, i32
  }
  func.func @transform_5(%arg0: i32) -> (i32, i32, i32) {
    %c7_i32 = arith.constant 7 : i32
    %0 = arith.subi %c7_i32, %arg0 : i32
    %c0_i32 = arith.constant 0 : i32
    %c0_i32_0 = arith.constant 0 : i32
    %c0_i32_1 = arith.constant 0 : i32
    return %0, %c0_i32, %c0_i32_0 : i32, i32, i32
  }
  func.func @transform_6(%arg0: i32) -> (i32, i32) {
    %c0_i32 = arith.constant 0 : i32
    %c0_i32_0 = arith.constant 0 : i32
    %c0_i32_1 = arith.constant 0 : i32
    return %c0_i32, %c0_i32_0 : i32, i32
  }
  func.func @transform_7(%arg0: i32) -> (i32, i32) {
    %c0_i32 = arith.constant 0 : i32
    %c0_i32_0 = arith.constant 0 : i32
    %c0_i32_1 = arith.constant 0 : i32
    return %c0_i32, %c0_i32_0 : i32, i32
  }
}

</mosaic_0001>

<bundles_post_ra>
// kernel: tpu_custom_call.1
= control target key start
LH: loop header
LB: loop body
LE: loop exit
PB: predicated region body
PF: predicated region fallthrough
CT: control target
= control target key end

     0   :  { %s1736_s0 = inlined_call_operand.vmem [shape: s32[2,1], index: 0, kind: input, shape index: {}]   ;;  %s1737_s1 = inlined_call_operand.hbm [shape: f32[8,2,256], index: 1, kind: input, shape index: {}]   ;;  %s1738_s2 = inlined_call_operand.hbm [shape: f32[8,2,256], index: 2, kind: input, shape index: {}]   ;;  %s1739_s3 = inlined_call_operand.hbm [shape: bf16[64,256], index: 3, kind: input, shape index: {}]   ;;  %s1740_s4 = inlined_call_operand.hbm [shape: f32[8,2,32], index: 4, kind: output, shape index: {0}]   ;;  %s1741_s5 = inlined_call_operand.hbm [shape: f32[8,2,32], index: 5, kind: output, shape index: {1}]   ;;  %s1742_s6 = inlined_call_operand.hbm [shape: f32[2,64], index: 6, kind: output, shape index: {2}]   ;;  %s1743_s7 = inlined_call_operand.hbm [shape: f32[2,64], index: 7, kind: output, shape index: {3}]  }
   0x1   :  { %1757 = sst [smem:[#allocation25_spill]] %s1737_s1 }
   0x2   :  { %1758 = sst [smem:[#allocation26_spill]] %s1739_s3 }
   0x3   :  { %13 = vsyncpa [#allocation3], 0 }
   0x4   :  { %15 = vsyncpa [#allocation3 + $0x1], 0 }
   0x5   :  { %16 = vsyncpa [#allocation6], 0 }
   0x6   :  { %18 = vsyncpa [#allocation6 + $0x1], 0 }
   0x7   :  { %19 = vsyncpa [#allocation4], 0 }
   0x8   :  { %21 = vsyncpa [#allocation4 + $0x1], 0 }
   0x9   :  { %22 = vsyncpa [#allocation10], 0 }
   0xa   :  { %24 = vsyncpa [#allocation10 + $0x1], 0 }
   0xb   :  { %25 = vsyncpa [#allocation13], 0  ;;  %s1290_s24 = smov 0   ;;  %s1292_s25 = smov 0  }
   0xc   :  { %s1294_s26 = smov 0   ;;  %s1296_s27 = smov 0  }
   0xd   :  { %s1298_s28 = smov 0   ;;  %s1300_s29 = smov 0  }
   0xe   :  { %s1302_s30 = smov 0  }
   0xf LB: > { %1759 = sst [smem:[#allocation21_spill]] %s1230_s29  ;;  %s1236_s8 = smov [#allocation7]   ;;  %s1234_s30 = sphi %s1302_s30, %s1803_s30   ;;  %s1230_s29 = sphi %s1300_s29, %s1806_s29   ;;  %s1226_s28 = sphi %s1298_s28, %s1811_s28   ;;  %s1222_s27 = sphi %s1296_s27, %s1810_s27   ;;  %s1218_s26 = sphi %s1294_s26, %s1809_s26   ;;  %s1214_s25 = sphi %s1292_s25, %s1808_s25   ;;  %s1210_s24 = sphi %s1290_s24, %s1807_s24  }
  0x10   : > { %s243_s9 = sshll.u32 %s1236_s8, 4  ;;  %s1326_s10 = sadd.s32 4294967295, %s1234_s30   ;;  %s244_s9 = int_to_ptr.vmem [resolvable:$true] %s243_s9 }
  0x11   : > { %p774_p0 = scmp.ge.s32.totalorder %s1234_s30, 1  ;;  %p1744_p1 = scmp.eq.s32.totalorder %s1326_s10, 0 }
  0x12   : > { %p228_p2 = scmp.lt.s32.totalorder %s1234_s30, 9  ;;  %s1746_s13 = sadd.s32 4294967294, %s1234_s30  }
  0x13   : > { %s1762_s3 = sld [smem:[#allocation26_spill]] }
  0x14   : > { %p1332_p4 = pnand %p774_p0, %p228_p2 }
  0x16   : > { %s1760_s11 = scalar_select %p1332_p4, 1, 0 }
  0x17   : > { %p833_p5 = pneg %p1332_p4 }
  0x19   : > { %p1340_p6 = pnand %p833_p5, %p1744_p1  ;;  %s955_s16 = scalar_lea.hbm %s1762_s3, 1024 }
  0x1a   : > { %p956_p7 = scmp.ne.s32.totalorder %s1762_s3, %s955_s16  ;;  %p962_p11 = scmp.lt.u32.totalorder %s955_s16, %s1762_s3 }
  0x1b   : > { %p957_p8 = pneg %p1340_p6 }
  0x1d   : > { %p958_p9 = pnand %p957_p8, %p956_p7 }
  0x1f   : > { %p959_p10 = pneg %p958_p9 }
  0x21   : > { %p964_p12 = pnand %p962_p11, %p959_p10 }
  0x23   : > { %967 = shalt.err (!%p964_p12)
}
  0x24   : > { %s968_s21 = scalar_lea.vmem %s244_s9, 1024  ;;  %p976_p5 = scmp.lt.s32.totalorder %s244_s9, %s244_s9 }
  0x25   : > { %p969_p13 = scmp.ne.s32.totalorder %s244_s9, %s968_s21  ;;  %p977_p3 = scmp.lt.s32.totalorder %s968_s21, %s968_s21 }
  0x27   : > { %p971_p0 = pnand %p969_p13, %p957_p8  ;;  %p978_p1 = por %p977_p3, %p976_p5 }
  0x29   : > { %p972_p2 = pneg %p971_p0 }
  0x2b   : > { %p979_p4 = pnand %p978_p1, %p972_p2 }
  0x2d   : > { %982 = shalt.err (!%p979_p4)
}
  0x2e   : > { %s1237_s22 = smov 128   ;;  %s1238_s23 = smov 8  }
  0x2f   : > { %836 = dma.hbm_to_vmem [thread:$0]  (!%p1340_p6), %s1762_s3, 1024, %s244_s9, [#allocation6], %s1237_s22, %s1237_s22, %s1238_s23  }
  0x30   : > { %p66_p1 = scmp.ne.s32.totalorder %s1230_s29, %s1226_s28  ;;  %p1749_p3 = scmp.eq.s32.totalorder %s1234_s30, 0 }
  0x31   : > { %p72_p4 = scmp.ne.s32.totalorder %s1226_s28, %s1222_s27  ;;  %p1748_p7 = scmp.eq.s32.totalorder %s1326_s10, 7 }
  0x32   : > { %p1370_p8 = scmp.eq.s32.totalorder %s1746_s13, 7  ;;  %p68_p9 = por %p1749_p3, %p66_p1 }
  0x33   : > { %p1764_p10 = scmp.eq.s32.totalorder %s1326_s10, 0  ;;  %p1384_p6 = por %p1748_p7, %p66_p1 }
  0x34   : > { %p1390_p12 = por %p1370_p8, %p72_p4  ;;  %p1747_p13 = scmp.lt.s32.totalorder %s1234_s30, 8 }
  0x35   : > { %p1378_p11 = por %p1764_p10, %p72_p4  ;;  %s257_s18 = sand.u32 1, %s1230_s29  }
  0x36   : > { %s1766_s9 = scalar_select %p1384_p6, 1, 0 }
  0x37   : > { %s1765_s12 = scalar_select %p1378_p11, 1, 0 }
  0x38   : > { %s1767_s17 = scalar_select %p1390_p12, 1, 0 }
  0x39   : > { %s777_s19 = sshll.u32 %s257_s18, 1  ;;  %s811_s20 = sshll.u32 %s1234_s30, 6 }
  0x3a   : > { %s1768_s1 = sld [smem:[#allocation25_spill]]  ;;  %s261_s8 = scalar_lea.vmem [#allocation2], %s777_s19 }
  0x3b   : > { %s269_s14 = sshll.u32 %s261_s8, 4  ;;  %p1406_p0 = pnand %p1747_p13, %p68_p9  ;;  %s1402_s14 = int_to_ptr.vmem [resolvable:$true] %s269_s14 }
  0x3c   : > { %s258_s15 = scalar_lea.sflag [#allocation3], %s257_s18 }
  0x3d   : > { %p985_p5 = pneg %p1406_p0 }
  0x40   : > { %s1400_s23 = scalar_lea.hbm %s1768_s1, %s811_s20  ;;  %s988_s21 = scalar_lea.hbm %s1768_s1, 512 }
  0x41   : > { %s983_s3 = scalar_lea.hbm %s1400_s23, 32  ;;  %p989_p9 = scmp.lt.u32.totalorder %s1400_s23, %s1768_s1 }
  0x42   : > { %p984_p2 = scmp.ne.s32.totalorder %s1400_s23, %s983_s3  ;;  %p990_p10 = scmp.lt.u32.totalorder %s988_s21, %s983_s3 }
  0x43   : > { %p992_p7 = scmp.lt.u32.totalorder %s983_s3, %s1400_s23 }
  0x44   : > { %p986_p1 = pnand %p985_p5, %p984_p2  ;;  %p991_p13 = por %p990_p10, %p989_p9 }
  0x46   : > { %p987_p4 = pneg %p986_p1  ;;  %p993_p3 = por %p992_p7, %p991_p13 }
  0x48   : > { %p994_p12 = pnand %p993_p3, %p987_p4 }
  0x4a   : > { %997 = shalt.err (!%p994_p12)
}
  0x4b   : > { %s998_s18 = scalar_lea.vmem %s1402_s14, 32  ;;  %s1239_s19 = smov [#allocation2]  }
  0x4c   : > { %p999_p2 = scmp.ne.s32.totalorder %s1402_s14, %s998_s18  ;;  %s1003_s20 = sshll.u32 %s1239_s19, 4  ;;  %s1004_s20 = int_to_ptr.vmem [resolvable:$false] %s1003_s20 }
  0x4d   : > { %s1005_s22 = scalar_lea.vmem %s1004_s20, 64  ;;  %p1006_p11 = scmp.lt.s32.totalorder %s1402_s14, %s1004_s20 }
  0x4e   : > { %p1001_p1 = pnand %p999_p2, %p985_p5  ;;  %p1007_p9 = scmp.lt.s32.totalorder %s1005_s22, %s998_s18 }
  0x50   : > { %p1002_p6 = pneg %p1001_p1  ;;  %p1008_p10 = por %p1007_p9, %p1006_p11 }
  0x52   : > { %p1009_p7 = pnand %p1008_p10, %p1002_p6 }
  0x54   : > { %1012 = shalt.err (!%p1009_p7)
}
  0x55   : > { %840 = dma.hbm_to_vmem [thread:$0]  (!%p1406_p0), %s1400_s23, 32, %s1402_s14, %s258_s15  }
  0x56   : > { %s1436_s3 = sadd.s32 1, %s1234_s30   ;;  %s82_s21 = ssub.s32 7, %s1234_s30 }
  0x57   : > { %1770 = sst [smem:[#allocation22_spill]] %s1436_s3  ;;  %s56_s13 = ssub.s32 %s1234_s30, %s1436_s3 }
  0x58   : > { %p57_p3 = scmp.eq.s32.totalorder %s56_s13, 0  ;;  %s83_s8 = ssub.s32 7, %s1436_s3 }
  0x59   : > { %s84_s18 = ssub.s32 %s82_s21, %s83_s8  ;;  %s87_s19 = sadd.s32 1, %s1218_s26 }
  0x5a   : > { %s1771_s20 = sadd.s32 1, %s1230_s29  ;;  %p85_p11 = scmp.eq.s32.totalorder %s84_s18, 0 }
  0x5b   : > { %s1446_s22 = scalar_select %p57_p3, %s1230_s29, %s1771_s20  }
  0x5c   : > { %p94_p6 = scmp.ne.s32.totalorder %s1218_s26, %s1214_s25  ;;  %p100_p12 = scmp.ne.s32.totalorder %s1214_s25, %s1210_s24 }
  0x5d   : > { %1772 = sst [smem:[#allocation23_spill]] %s1446_s22  ;;  %s276_s15 = sand.u32 1, %s1234_s30  }
  0x5e   : > { %s1454_s23 = scalar_select %p85_p11, %s1218_s26, %s87_s19  }
  0x5f   : > { %p1774_p13 = scmp.eq.s32.totalorder %s1234_s30, 0  ;;  %p1775_p5 = scmp.eq.s32.totalorder %s1326_s10, 0 }
  0x60   : > { %1773 = sst [smem:[#allocation24_spill]] %s1454_s23  ;;  %p1777_p2 = scmp.eq.s32.totalorder %s1326_s10, 7 }
  0x61   : > { %p96_p0 = por %p94_p6, %p1774_p13  ;;  %p1460_p4 = por %p100_p12, %p1775_p5 }
  0x62   : > { %p1466_p1 = por %p1777_p2, %p94_p6  ;;  %p1472_p9 = por %p1370_p8, %p100_p12 }
  0x63   : > { %s278_s24 = sand.u32 1, %s1218_s26   ;;  %s812_s19 = sshll.u32 %s82_s21, 6 }
  0x64   : > { %s1778_s13 = scalar_select %p1466_p1, 1, 0 }
  0x65   : > { %s1779_s8 = scalar_select %p1472_p9, 1, 0 }
  0x66   : > { %s780_s18 = sshll.u32 %s278_s24, 1  ;;  %s674_s22 = scalar_lea.hbm %s1738_s2, %s812_s19 }
  0x67   : > { %s1480_s29 = scalar_lea.hbm %s674_s22, 32  ;;  %s280_s23 = scalar_lea.vmem [#allocation5], %s780_s18 }
  0x68   : > { %s290_s3 = sshll.u32 %s280_s23, 4  ;;  %p1780_p8 = scmp.lt.s32.totalorder %s1234_s30, 8  ;;  %s1482_s3 = int_to_ptr.vmem [resolvable:$true] %s290_s3 }
  0x69   : > { %s277_s21 = scalar_lea.sflag [#allocation6], %s276_s15  ;;  %s1043_s24 = scalar_lea.hbm %s674_s22, 64 }
  0x6a   : > { %p1486_p10 = pnand %p1780_p8, %p96_p0  ;;  %p1014_p7 = scmp.ne.s32.totalorder %s1480_s29, %s1043_s24 }
  0x6b   : > { %s1018_s18 = scalar_lea.hbm %s1738_s2, 512  ;;  %p1019_p12 = scmp.lt.u32.totalorder %s1480_s29, %s1738_s2 }
  0x6c   : > { %p1015_p3 = pneg %p1486_p10  ;;  %p1020_p13 = scmp.lt.u32.totalorder %s1018_s18, %s1043_s24 }
  0x6d   : > { %p1022_p5 = scmp.lt.u32.totalorder %s1043_s24, %s1480_s29 }
  0x6e   : > { %p1016_p11 = pnand %p1015_p3, %p1014_p7  ;;  %p1021_p0 = por %p1020_p13, %p1019_p12 }
  0x70   : > { %p1017_p6 = pneg %p1016_p11  ;;  %p1023_p2 = por %p1022_p5, %p1021_p0 }
  0x72   : > { %p1024_p8 = pnand %p1023_p2, %p1017_p6 }
  0x74   : > { %1027 = shalt.err (!%p1024_p8)
}
  0x75   : > { %s1028_s22 = scalar_lea.vmem %s1482_s3, 32  ;;  %s1240_s15 = smov [#allocation5]  }
  0x76   : > { %p1029_p7 = scmp.ne.s32.totalorder %s1482_s3, %s1028_s22  ;;  %s1033_s1 = sshll.u32 %s1240_s15, 4  ;;  %s1034_s1 = int_to_ptr.vmem [resolvable:$false] %s1033_s1 }
  0x77   : > { %s1035_s23 = scalar_lea.vmem %s1034_s1, 64  ;;  %p1036_p1 = scmp.lt.s32.totalorder %s1482_s3, %s1034_s1 }
  0x78   : > { %p1031_p11 = pnand %p1029_p7, %p1015_p3  ;;  %p1037_p12 = scmp.lt.s32.totalorder %s1035_s23, %s1028_s22 }
  0x7a   : > { %p1032_p9 = pneg %p1031_p11  ;;  %p1038_p13 = por %p1037_p12, %p1036_p1 }
  0x7c   : > { %p1039_p0 = pnand %p1038_p13, %p1032_p9 }
  0x7e   : > { %1042 = shalt.err (!%p1039_p0)
}
  0x7f   : > { %843 = dma.hbm_to_vmem [thread:$0]  (!%p1486_p10), %s1480_s29, 32, %s1482_s3, %s277_s21  }
  0x80   : > { %p1782_p6 = scmp.ne.s32.totalorder %s1760_s11, 0 }
  0x81   : > { %s1517_s24 = sand.u32 (!%p1782_p6), 1, %s1226_s28   ;;  %p1783_p1 = scmp.ne.s32.totalorder (!%p1782_p6), %s1765_s12, 0 }
  0x82   : > { %299 = sbr.rel (%p1782_p6) target bundleno = 1040 (0x410), region = 36  ;;  %s784_s18 = sshll.u32 (!%p1782_p6), %s1517_s24, 1 }
  0x83   : > { %s302_s19 = scalar_lea.sflag (!%p1782_p6), [#allocation3], %s1517_s24  ;;  %s1521_s20 = scalar_lea.vmem (!%p1782_p6), [#allocation2], %s784_s18 }
  0x89   : > { %1181 = dma.done.wait (%p1783_p1), %s302_s19, 32  }
  0x8a   : > { %1183 = vsyncadd (%p1783_p1), %s302_s19, 4294967264  ;;  %s1756_s29 = sand.u32 1, %s1326_s10   ;;  %s312_s11 = sand.u32 1, %s1214_s25  }
  0x8b   : > { %s1529_s3 = sshll.u32 %s312_s11, 1  ;;  %s311_s16 = scalar_lea.sflag [#allocation6], %s1756_s29 }
  0x8c   : > { %s314_s21 = scalar_lea.vmem [#allocation5], %s1529_s3 }
  0x8d   : > { %1185 = dma.done.wait (%p1460_p4), %s311_s16, 32  }
  0x8e   : > { %1187 = vsyncadd (%p1460_p4), %s311_s16, 4294967264  ;;  %p1784_p9 = scmp.eq.s32.totalorder %s1326_s10, 0 }
  0x90   : > { %1189 = dma.done.wait (%p1784_p9), [#allocation6], 1024   ;;  %p1785_p10 = pmov %p1784_p9 }
  0x91   : > { %s1542_s12 = scalar_lea.vmem [#allocation8], %s784_s18  ;;  %s354_s22 = scalar_lea.vmem [#allocation9], %s1529_s3 }
  0x92   : > { %1191 = vsyncadd (%p1785_p10), [#allocation6], 4294966272  ;;  %p1786_p3 = scmp.ne.s32.totalorder %s1326_s10, 0 }
  0x93   : > { %vm366_vm0 = vcmask (!%p1786_p3), 517120   ;;  %v1241_v0 = vmov (!%p1786_p3), 0.0  }
  0x94   : > { %365 = sbr.rel (%p1786_p3) target bundleno = 155 (0x9b), region = 52  ;;  %367 = vst.msk [vmem:[#allocation11] sm:$0x3] (!%p1786_p3), %vm366_vm0, %v1241_v0  ;;  %368 = vst.msk [vmem:[#allocation12] sm:$0x3] (!%p1786_p3), %vm366_vm0, %v1241_v0 }
  0x9b PF: > { %v927_v1 = vld [vmem:[#allocation7 + $0x4] ss:$8 sps:$4 sm:$0xff]   ;;  %v929_v2 = vld [vmem:[#allocation7] ss:$8 sps:$4 sm:$0xff]   ;;  %v1242_v3 = vmov 0   ;;  %s1243_s14 = smov 32   ;;  %v536_v49 = vlaneseq  ;;  %v540_v52 = vstv %s1326_s10 }
  0x9c   : > { %456 = vmatprep.mubr.bf16.mxu0 %v1242_v3  ;;  %925 = vset.pattern.permute.xlu1 %v1242_v3  ;;  %v930_v4 = vld [vmem:[#allocation7 + $0x14] ss:$8 sps:$4 sm:$0xff]   ;;  %v932_v5 = vld [vmem:[#allocation7 + $0x10] ss:$8 sps:$4 sm:$0xff]   ;;  %v933_v6 = vld [vmem:[#allocation7 + $0x24] ss:$8 sps:$4 sm:$0xff]  }
  0x9d   : > { %424 = vmatprep.subr.bf16.mxu0 %v927_v1  ;;  %926 = vset.pattern.permute.xlu0 %v1242_v3  ;;  %v1547_v7 = vld [vmem:[#allocation12] sm:$0x3]  ;;  %v936_v9 = vld [vmem:[#allocation7 + $0x34] ss:$8 sps:$4 sm:$0xff]   ;;  %v938_v10 = vld [vmem:[#allocation7 + $0x30] ss:$8 sps:$4 sm:$0xff]  }
  0x9e   : > { %425 = vmatpush1.bf16.msra.mxu0 %v929_v2  ;;  %477 = vrot.lane.b32.xlu1 %v1547_v7, %s1243_s14  ;;  %v935_v8 = vld [vmem:[#allocation7 + $0x20] ss:$8 sps:$4 sm:$0xff]   ;;  %vm420_vm1 = vcmask 523264   ;;  %v465_v13 = vld [vmem:[%s1521_s20] sm:$0x3]  ;;  %s1244_s15 = smov 64  }
  0x9f   : > { %426 = vmatprep.subr.bf16.mxu0 %v930_v4  ;;  %v1551_v11 = vld [vmem:[#allocation11] sm:$0x3]  ;;  %v467_v15 = vld [vmem:[%s314_s21] sm:$0x3]  ;;  %v543_v43 = vld [vmem:[%s1736_s0] sm:$0x3] }
  0xa0   : > { %v371_v12 = vpack.c.bf16 %v1551_v11, %v1551_v11  ;;  %s1245_s18 = smov 96   ;;  %v537_v50 = vand.u32 127, %v536_v49  ;;  %s539_s19 = ssub.s32 7, %s1326_s10  ;;  %vm529_vm3 = vcmask 261120   ;;  %vm554_vm4 = vcmask 254976  }
  0xa1   : > { %v541_v53 = vstv %s539_s19  ;;  %s803_s20 = sshll.u32 %s1326_s10, 5  ;;  %s580_s11 = sshll.u32 %s1542_s12, 4  ;;  %vm549_vm5 = vcmask 517120   ;;  %s1582_s11 = int_to_ptr.vmem [resolvable:$true] %s580_s11 }
  0xa2   : > { %427 = vmatpush1.bf16.msra.mxu0 %v932_v5  ;;  %vm538_vm2 = vcmp.lt.s32.totalorder %v537_v50, 32  ;;  %s1246_s16 = smov [#allocation12]   ;;  %s1580_s1 = scalar_lea.hbm %s1740_s4, %s803_s20 }
  0xa3   : > { %428 = vmatprep.subr.bf16.mxu0 %v933_v6  ;;  %v542_v55 = vsel %vm538_vm2, %v540_v52, %v541_v53  ;;  %s616_s21 = sshll.u32 %s1246_s16, 4  ;;  %s562_s23 = scalar_lea.sflag [#allocation4], %s1517_s24  ;;  %s1586_s21 = int_to_ptr.vmem [resolvable:$true] %s616_s21 }
  0xa4   : > { %s1044_s20 = scalar_lea.vmem %s1582_s11, 32  ;;  %p1787_p5 = scmp.ne.s32.totalorder %s1766_s9, 0 }
  0xa5   : > { %p1045_p4 = scmp.ne.s32.totalorder %s1582_s11, %s1044_s20  ;;  %s1247_s16 = smov [#allocation8]  }
  0xa6   : > { %429 = vmatpush1.bf16.msra.mxu0 %v935_v8 }
  0xa7   : > { %430 = vmatprep.subr.bf16.mxu0 %v936_v9  ;;  %p1046_p2 = pnand %p1045_p4, %p1787_p5 }
  0xa9   : > { %p1047_p8 = pneg %p1046_p2 }
  0xaa   : > { %431 = vmatpush1.bf16.msra.mxu0 %v938_v10 }
  0xad   : > { %798 = vmatmul.mubr.msk.bf16.vlgmr.msra.gmra.mrb[0].mxu0 %vm420_vm1, %v371_v12 }
 0x110   : > { %v478_v35 = vpop.permute.xlu1 %477 }
 0x180   : > { %v458_v14 = vpop.f32.mrb[0].mxu0 }
 0x181   : > { %v466_v16 = vadd.f32 %v465_v13, %v458_v14  ;;  %v460_v17 = vpop.f32.mrb[1].mxu0 }
 0x182   : > { %v462_v18 = vpop.f32.mrb[2].mxu0  ;;  %v468_v19 = vadd.f32 %v467_v15, %v460_v17 }
 0x183   : > { %939 = vtanh.f32 %v466_v16  ;;  %v463_v20 = vpop.f32.mrb[3].mxu0  ;;  %v799_v23 = vmul.f32 -1.442695, %v466_v16 }
 0x184   : > { %941 = vtanh.f32 %v468_v19  ;;  %v800_v24 = vmul.f32 -1.442695, %v468_v19 }
 0x185   : > { %943 = vpow2.f32 %v799_v23 }
 0x186   : > { %945 = vpow2.f32 %v800_v24 }
 0x18d   : > { %v940_v21 = vpop.eup %939 }
 0x18e   : > { %482 = vrot.lane.b32.xlu0 %v940_v21, %s1244_s15  ;;  %v942_v22 = vpop.eup %941 }
 0x18f   : > { %v944_v25 = vpop.eup %943 }
 0x190   : > { %v472_v26 = vadd.f32 1.0, %v944_v25  ;;  %v946_v27 = vpop.eup %945 }
 0x191   : > { %v500_v28 = vadd.f32 1.0, %v946_v27 }
 0x192   : > { %506 = vrot.lane.b32.xlu0 %v942_v22, %s1244_s15  ;;  %947 = vrcp.f32 %v472_v26 }
 0x193   : > { %949 = vrcp.f32 %v500_v28 }
 0x19c   : > { %v948_v29 = vpop.eup %947 }
 0x19d   : > { %v950_v32 = vpop.eup %949  ;;  %v480_v36 = vmul.f32 %v948_v29, %v478_v35 }
 0x19e   : > { %v504_v39 = vmul.f32 %v950_v32, %v1547_v7 }
 0x200   : > { %v483_v30 = vpop.permute.xlu0 %482 }
 0x201   : > { %v485_v31 = vmul.f32 %v948_v29, %v483_v30 }
 0x203   : > { %487 = vrot.lane.b32.xlu1 %v485_v31, %s1243_s14 }
 0x204   : > { %v507_v33 = vpop.permute.xlu0 %506 }
 0x205   : > { %v509_v34 = vmul.f32 %v950_v32, %v507_v33 }
 0x207   : > { %511 = vrot.lane.b32.xlu0 %v509_v34, %s1243_s14 }
 0x275   : > { %v488_v37 = vpop.permute.xlu1 %487 }
 0x276   : > { %v490_v38 = vadd.f32 %v488_v37, %v480_v36 }
 0x278   : > { %951 = vtanh.f32 %v490_v38 }
 0x279   : > { %v512_v40 = vpop.permute.xlu0 %511 }
 0x27a   : > { %v514_v41 = vadd.f32 %v512_v40, %v504_v39 }
 0x27c   : > { %953 = vtanh.f32 %v514_v41 }
 0x282   : > { %v952_v42 = vpop.eup %951 }
 0x283   : > { %493 = vrot.lane.b32.xlu1 %v952_v42, %s1244_s15 }
 0x286   : > { %v954_v44 = vpop.eup %953 }
 0x287   : > { %517 = vrot.lane.b32.xlu0 %v954_v44, %s1244_s15  ;;  %545 = vperm.xlu1 %925, %v543_v43  }
 0x2f5   : > { %v494_v45 = vpop.permute.xlu1 %493 }
 0x2f6   : > { %v496_v46 = vmul.f32 %v948_v29, %v494_v45 }
 0x2f8   : > { %522 = vrot.lane.b32.xlu0 %v496_v46, %s1243_s14  ;;  %s1048_s14 = sshll.u32 %s1247_s16, 4  ;;  %s1049_s14 = int_to_ptr.vmem [resolvable:$false] %s1048_s14 }
 0x2f9   : > { %v518_v47 = vpop.permute.xlu0 %517  ;;  %p1051_p7 = scmp.lt.s32.totalorder %s1582_s11, %s1049_s14 }
 0x2fa   : > { %v520_v48 = vmul.f32 %v950_v32, %v518_v47 }
 0x2fc   : > { %532 = vrot.lane.b32.xlu0 %v490_v38, %s1245_s18  ;;  %526 = vrot.lane.b32.xlu1 %v520_v48, %s1244_s15  ;;  %s1050_s15 = scalar_lea.vmem %s1049_s14, 64 }
 0x2fd   : > { %p1052_p11 = scmp.lt.s32.totalorder %s1050_s15, %s1044_s20 }
 0x2ff   : > { %p1053_p12 = por %p1052_p11, %p1051_p7 }
 0x301   : > { %p1054_p13 = pnand %p1053_p12, %p1047_p8 }
 0x306   : > { %v546_v51 = vpop.permute.xlu1 %545 }
 0x307   : > { %vm547_vm6 = vcmp.gt.s32.totalorder %v546_v51, %v542_v55 }
 0x36a   : > { %v523_v54 = vpop.permute.xlu0 %522 }
 0x36e   : > { %v527_v56 = vpop.permute.xlu1 %526  ;;  %v533_v57 = vpop.permute.xlu0 %532 }
 0x36f   : > { %v530_v58 = vsel %vm529_vm3, %v523_v54, %v527_v56  ;;  %v535_v59 = vsel %vm529_vm3, %v533_v57, %v514_v41 }
 0x370   : > { %v553_v60 = vsel %vm547_vm6, %v530_v58, 0.0  ;;  %v548_v61 = vsel %vm547_vm6, %v530_v58, %v1551_v11  ;;  %v551_v62 = vsel %vm547_vm6, %v535_v59, %v1547_v7 }
 0x371   : > { %557 = vrot.lane.b32.xlu1 %v553_v60, %s1245_s18  ;;  %555 = vst.msk [vmem:[%s1542_s12] sm:$0x3] %vm554_vm4, %v553_v60 }
 0x372   : > { %550 = vst.msk [vmem:[#allocation11] sm:$0x3] %vm549_vm5, %v548_v61  ;;  %552 = vst.msk [vmem:[#allocation12] sm:$0x3] %vm549_vm5, %v551_v62 }
 0x373   : > { %1057 = shalt.err (!%p1054_p13)
}
 0x374   : > { %s1058_s24 = scalar_lea.hbm %s1580_s1, 32  ;;  %s1062_s16 = scalar_lea.hbm %s1740_s4, 256 }
 0x375   : > { %p1059_p0 = scmp.ne.s32.totalorder %s1580_s1, %s1058_s24  ;;  %p1063_p9 = scmp.lt.u32.totalorder %s1580_s1, %s1740_s4 }
 0x376   : > { %p1064_p10 = scmp.lt.u32.totalorder %s1062_s16, %s1058_s24  ;;  %p1066_p4 = scmp.lt.u32.totalorder %s1058_s24, %s1580_s1 }
 0x377   : > { %p1060_p6 = pnand %p1059_p0, %p1787_p5 }
 0x378   : > { %p1065_p3 = por %p1064_p10, %p1063_p9 }
 0x379   : > { %p1061_p1 = pneg %p1060_p6 }
 0x37a   : > { %p1067_p2 = por %p1066_p4, %p1065_p3 }
 0x37c   : > { %p1068_p8 = pnand %p1067_p2, %p1061_p1 }
 0x37e   : > { %1071 = shalt.err (!%p1068_p8)
}
 0x37f   : > { %821 = dma.vmem_to_hbm [thread:$0]  (%p1787_p5), %s1582_s11, 32, %s1580_s1, %s562_s23  }
 0x380   : > { %s1072_s20 = scalar_lea.vmem %s1586_s21, 32  ;;  %p1788_p11 = scmp.eq.s32.totalorder %s1326_s10, 7 }
 0x381   : > { %p1073_p7 = scmp.ne.s32.totalorder %s1586_s21, %s1072_s20  ;;  %p1079_p0 = scmp.lt.s32.totalorder %s1586_s21, %s1586_s21 }
 0x382   : > { %p1080_p6 = scmp.lt.s32.totalorder %s1072_s20, %s1072_s20 }
 0x383   : > { %p1074_p12 = pnand %p1073_p7, %p1788_p11 }
 0x384   : > { %p1081_p9 = por %p1080_p6, %p1079_p0 }
 0x385   : > { %p1075_p13 = pneg %p1074_p12 }
 0x387   : > { %p1082_p1 = pnand %p1081_p9, %p1075_p13 }
 0x389   : > { %1085 = shalt.err (!%p1082_p1)
}
 0x38a   : > { %s1086_s15 = scalar_lea.hbm %s1743_s7, 32  ;;  %p1789_p10 = pmov %p1788_p11 }
 0x38b   : > { %p1087_p5 = scmp.ne.s32.totalorder %s1743_s7, %s1086_s15  ;;  %p1092_p2 = scmp.lt.u32.totalorder %s1086_s15, %s1743_s7 }
 0x38d   : > { %p1088_p3 = pnand %p1087_p5, %p1789_p10 }
 0x38f   : > { %p1089_p4 = pneg %p1088_p3 }
 0x391   : > { %p1094_p8 = pnand %p1092_p2, %p1089_p4 }
 0x393   : > { %1097 = shalt.err (!%p1094_p8)
}
 0x394   : > { %p1790_p7 = pmov %p1789_p10  ;;  %s804_s16 = sshll.u32 %s539_s19, 5 }
 0x395   : > { %s594_s14 = sshll.u32 %s354_s22, 4  ;;  %s1248_s20 = smov [#allocation11]   ;;  %s1645_s14 = int_to_ptr.vmem [resolvable:$true] %s594_s14 }
 0x396   : > { %826 = dma.vmem_to_hbm [thread:$0]  (%p1790_p7), %s1586_s21, 32, %s1743_s7, [#allocation13]  }
 0x397   : > { %s605_s29 = sshll.u32 %s1248_s20, 4  ;;  %s1643_s24 = scalar_lea.hbm %s1741_s5, %s804_s16  ;;  %s1647_s29 = int_to_ptr.vmem [resolvable:$true] %s605_s29 }
 0x398   : > { %s1791_s19 = sand.u32 1, %s1326_s10   ;;  %s1098_s12 = scalar_lea.vmem %s1645_s14, 32 }
 0x399   : > { %s567_s21 = scalar_lea.sflag [#allocation10], %s1791_s19  ;;  %p1099_p11 = scmp.ne.s32.totalorder %s1645_s14, %s1098_s12 }
 0x39a   : > { %p1792_p12 = scmp.ne.s32.totalorder %s1778_s13, 0  ;;  %s1249_s11 = smov [#allocation9]  }
 0x39b   : > { %s1102_s1 = sshll.u32 %s1249_s11, 4  ;;  %s1103_s1 = int_to_ptr.vmem [resolvable:$false] %s1102_s1 }
 0x39c   : > { %p1100_p13 = pnand %p1099_p11, %p1792_p12  ;;  %s1104_s23 = scalar_lea.vmem %s1103_s1, 64 }
 0x39d   : > { %p1105_p6 = scmp.lt.s32.totalorder %s1645_s14, %s1103_s1  ;;  %p1106_p9 = scmp.lt.s32.totalorder %s1104_s23, %s1098_s12 }
 0x39e   : > { %p1101_p0 = pneg %p1100_p13 }
 0x39f   : > { %p1107_p1 = por %p1106_p9, %p1105_p6 }
 0x3a1   : > { %p1108_p5 = pnand %p1107_p1, %p1101_p0 }
 0x3e3   : > { %v558_v63 = vpop.permute.xlu1 %557 }
 0x3e4   : > { %560 = vst.msk [vmem:[%s354_s22] sm:$0x3] %vm554_vm4, %v558_v63 }
 0x3e5   : > { %1111 = shalt.err (!%p1108_p5)
}
 0x3e6   : > { %s1112_s3 = scalar_lea.hbm %s1643_s24, 32  ;;  %s1116_s16 = scalar_lea.hbm %s1741_s5, 256 }
 0x3e7   : > { %p1113_p10 = scmp.ne.s32.totalorder %s1643_s24, %s1112_s3  ;;  %p1117_p2 = scmp.lt.u32.totalorder %s1643_s24, %s1741_s5 }
 0x3e8   : > { %p1118_p8 = scmp.lt.u32.totalorder %s1116_s16, %s1112_s3  ;;  %p1120_p11 = scmp.lt.u32.totalorder %s1112_s3, %s1643_s24 }
 0x3e9   : > { %p1114_p3 = pnand %p1113_p10, %p1792_p12 }
 0x3ea   : > { %p1119_p7 = por %p1118_p8, %p1117_p2 }
 0x3eb   : > { %p1115_p4 = pneg %p1114_p3 }
 0x3ec   : > { %p1121_p13 = por %p1120_p11, %p1119_p7 }
 0x3ee   : > { %p1122_p0 = pnand %p1121_p13, %p1115_p4 }
 0x3f0   : > { %1125 = shalt.err (!%p1122_p0)
}
 0x3f1   : > { %822 = dma.vmem_to_hbm [thread:$0]  (%p1792_p12), %s1645_s14, 32, %s1643_s24, %s567_s21  }
 0x3f2   : > { %s1126_s15 = scalar_lea.vmem %s1647_s29, 32  ;;  %p1793_p9 = scmp.eq.s32.totalorder %s1326_s10, 7 }
 0x3f3   : > { %p1127_p6 = scmp.ne.s32.totalorder %s1647_s29, %s1126_s15  ;;  %p1133_p10 = scmp.lt.s32.totalorder %s1647_s29, %s1647_s29 }
 0x3f4   : > { %p1134_p3 = scmp.lt.s32.totalorder %s1126_s15, %s1126_s15 }
 0x3f5   : > { %p1128_p1 = pnand %p1127_p6, %p1793_p9 }
 0x3f6   : > { %p1135_p2 = por %p1134_p3, %p1133_p10 }
 0x3f7   : > { %p1129_p5 = pneg %p1128_p1 }
 0x3f9   : > { %p1136_p4 = pnand %p1135_p2, %p1129_p5 }
 0x3fb   : > { %1139 = shalt.err (!%p1136_p4)
}
 0x3fc   : > { %s1140_s12 = scalar_lea.hbm %s1742_s6, 32  ;;  %p1794_p8 = pmov %p1793_p9 }
 0x3fd   : > { %p1141_p12 = scmp.ne.s32.totalorder %s1742_s6, %s1140_s12  ;;  %p1146_p13 = scmp.lt.u32.totalorder %s1140_s12, %s1742_s6 }
 0x3ff   : > { %p1142_p7 = pnand %p1141_p12, %p1794_p8 }
 0x401   : > { %p1143_p11 = pneg %p1142_p7 }
 0x403   : > { %p1148_p0 = pnand %p1146_p13, %p1143_p11 }
 0x405   : > { %1151 = shalt.err (!%p1148_p0)
}
 0x406   : > { %p1795_p6 = pmov %p1794_p8 }
 0x408   : > { %824 = dma.vmem_to_hbm [thread:$0]  (%p1795_p6), %s1647_s29, 32, %s1742_s6, [#allocation10]  }
 0x409   : > { %p1796_p9 = pmov %p1795_p6 }
 0x40a   : > { %p1797_p1 = pmov %p1795_p6 }
 0x40b   : > { %1193 = dma.done.wait (%p1796_p9), [#allocation10], 32  }
 0x40c   : > { %1195 = vsyncadd (%p1797_p1), [#allocation10], 4294967264  ;;  %p1798_p5 = pmov %p1797_p1 }
 0x40d   : > { %p1799_p10 = pmov %p1797_p1 }
 0x40e   : > { %1197 = dma.done.wait (%p1798_p5), [#allocation13], 32  }
 0x40f   : > { %1199 = vsyncadd (%p1799_p10), [#allocation13], 4294967264 }
 0x410 PF: > { %p858_p3 = scmp.ge.s32.totalorder %s1234_s30, 2  ;;  %s636_s3 = sand.u32 1, %s1222_s27  }
 0x411   : > { %p1800_p2 = scmp.ne.s32.totalorder %s1767_s17, 0  ;;  %s637_s29 = scalar_lea.sflag [#allocation4], %s636_s3 }
 0x413   : > { %p845_p4 = pnand %p858_p3, %p1800_p2 }
 0x415   : > { %1201 = dma.done.wait (!%p845_p4), %s637_s29, 32  }
 0x416   : > { %1203 = vsyncadd (!%p845_p4), %s637_s29, 4294967264  ;;  %s1801_s22 = sadd.s32 4294967294, %s1234_s30   ;;  %p1802_p12 = scmp.ne.s32.totalorder %s1779_s8, 0 }
 0x417   : > { %s645_s18 = sand.u32 1, %s1801_s22  }
 0x418   : > { %p848_p8 = pnand %p858_p3, %p1802_p12  ;;  %s646_s16 = scalar_lea.sflag [#allocation10], %s645_s18 }
 0x41a   : > { %1205 = dma.done.wait (!%p848_p8), %s646_s16, 32  }
 0x41b   : > { %1207 = vsyncadd (!%p848_p8), %s646_s16, 4294967264  ;;  %s1803_s30 = sld [smem:[#allocation22_spill]]  ;;  %s1804_s10 = sld [smem:[#allocation24_spill]] }
 0x41c   : > { %s1805_s20 = sld [smem:[#allocation21_spill]]  ;;  %s1806_s29 = sld [smem:[#allocation23_spill]] }
 0x41d   : > { %s1807_s24 = smov %s1214_s25  ;;  %s1808_s25 = smov %s1218_s26 }
 0x41e   : > { %s1810_s27 = smov %s1226_s28 }
 0x421   : > { %p28_p7 = scmp.ge.s32.totalorder %s1803_s30, 10   ;;  %s1809_s26 = smov %s1804_s10 }
 0x422   : > { %s1811_s28 = smov %s1805_s20 }
 0x423   :  { %30 = sbr.rel (!%p28_p7) target bundleno = 15 (0xf), region = 135 }
 0x42a   :  { %651 = vsyncpa [#allocation3], 1 }
 0x42b   :  { %653 = vsyncpa [#allocation3 + $0x1], 1 }
 0x42c   :  { %654 = vsyncpa [#allocation6], 1 }
 0x42d   :  { %656 = vsyncpa [#allocation6 + $0x1], 1 }
 0x42e   :  { %657 = vsyncpa [#allocation4], 1 }
 0x42f   :  { %659 = vsyncpa [#allocation4 + $0x1], 1 }
 0x430   :  { %660 = vsyncpa [#allocation10], 1 }
 0x431   :  { %662 = vsyncpa [#allocation10 + $0x1], 1 }
 0x432   :  { %663 = vsyncpa [#allocation13], 1 }

</bundles_post_ra>
